<compile_context>
chip_gen: v7x
topology: tpu7x:2x2x1
jax: 0.10.0
libtpu: 0.0.40
codegen_flags: <defaults>
</compile_context>

<pallas_src>
import functools

import numpy as np
import jax
import jax.numpy as jnp
from jax import lax
from jax.experimental import pallas as pl
from jax.experimental.pallas import tpu as pltpu


# ----------------------------------------------------------------------------
# Deterministic parameter / buffer construction (module __init__ equivalents)
# ----------------------------------------------------------------------------

def hann_window_nonperiodic(win_length: int) -> np.ndarray:
    # torch.hann_window(win_length, periodic=False)
    n = np.arange(win_length, dtype=np.float64)
    return (0.5 - 0.5 * np.cos(2.0 * np.pi * n / (win_length - 1))).astype(np.float32)


def kaldi_mel_banks(num_bins, window_length_padded, sample_freq, low_freq, high_freq):
    # torchaudio.compliance.kaldi.get_mel_banks with vtln_warp_factor == 1.0
    num_fft_bins = window_length_padded // 2
    nyquist = 0.5 * sample_freq
    if high_freq <= 0.0:
        high_freq += nyquist
    fft_bin_width = sample_freq / window_length_padded

    def mel_scale(f):
        return 1127.0 * np.log(1.0 + f / 700.0)

    mel_low = mel_scale(low_freq)
    mel_high = mel_scale(high_freq)
    mel_freq_delta = (mel_high - mel_low) / (num_bins + 1)

    b = np.arange(num_bins, dtype=np.float64)[:, None]
    left_mel = mel_low + b * mel_freq_delta
    center_mel = mel_low + (b + 1.0) * mel_freq_delta
    right_mel = mel_low + (b + 2.0) * mel_freq_delta

    mel = mel_scale(fft_bin_width * np.arange(num_fft_bins, dtype=np.float64))[None, :]
    up_slope = (mel - left_mel) / (center_mel - left_mel)
    down_slope = (right_mel - mel) / (right_mel - center_mel)
    bins = np.maximum(0.0, np.minimum(up_slope, down_slope))
    return bins.astype(np.float32)  # (num_bins, num_fft_bins)


def _round_up(x, m):
    return ((x + m - 1) // m) * m


def _build_constants(n_mels, sr, win_length, hopsize, n_fft, fmin, fmax):
    """Window-folded [cos | sin] DFT matrix and mel weights, lane-padded.

    Returns:
      w:    (n_chunks*hop, 2*NFP) float32, rows >= n_fft and cols outside the real
            n_freq range are zero.  Columns [0, NFP) = hann*cos, [NFP, 2*NFP) = -hann*sin.
      melw: (n_mels, NFP) float32 kaldi mel filterbank (extra Nyquist column stays 0).
    """
    n_freq = n_fft // 2 + 1
    nfp = _round_up(n_freq, 128)
    n_chunks = -(-n_fft // hopsize)
    kr = n_chunks * hopsize

    window = np.zeros(n_fft, dtype=np.float64)
    pad_l = (n_fft - win_length) // 2                     # torch.stft centers the window
    window[pad_l:pad_l + win_length] = hann_window_nonperiodic(win_length)

    n = np.arange(n_fft, dtype=np.float64)[:, None]
    k = np.arange(n_freq, dtype=np.float64)[None, :]
    ang = 2.0 * np.pi * n * k / n_fft
    cos_w = window[:, None] * np.cos(ang)                 # window folded in (no per-tile mul)
    sin_w = window[:, None] * -np.sin(ang)

    w = np.zeros((kr, 2 * nfp), dtype=np.float32)
    w[:n_fft, :n_freq] = cos_w
    w[:n_fft, nfp:nfp + n_freq] = sin_w

    melw = np.zeros((n_mels, nfp), dtype=np.float32)
    melw[:, :n_fft // 2] = kaldi_mel_banks(n_mels, n_fft, float(sr), float(fmin), float(fmax))
    return w, melw, nfp, n_chunks


# ----------------------------------------------------------------------------
# Pallas kernel
# ----------------------------------------------------------------------------

def _melstft_kernel(a_ref, b_ref, w_ref, melw_ref, out_ref, y_scratch,
                    *, tf, hop, n_chunks, nfp):
    # a_ref / b_ref: (1, TF, hop) adjacent hop-row blocks of the padded waveform; together
    # they cover rows [t*TF, (t+2)*TF), i.e. every sample of every frame in this tile.
    y_scratch[:tf, :] = a_ref[0]
    y_scratch[tf:, :] = b_ref[0]

    # Windowed DFT as n_chunks hop-wide K-chunk matmuls: frame f's samples
    # [j*hop, (j+1)*hop) live in hop-row (f + j), so chunk j is a row-shifted view.
    acc = jnp.zeros((tf, 2 * nfp), dtype=jnp.float32)
    for j in range(n_chunks):
        lhs = y_scratch[j:j + tf, :].astype(w_ref.dtype)   # static shifted slice
        acc = acc + jnp.dot(lhs, w_ref[j * hop:(j + 1) * hop, :],
                            preferred_element_type=jnp.float32)

    re = acc[:, :nfp]
    im = acc[:, nfp:]
    power = re * re + im * im                              # (TF, NFP), scale_factor=2 path

    # mel = mel_basis @ power^T -> (n_mels, TF): frame axis on lanes (lane-dense store).
    # Kept in f32, mirroring torch's autocast(enabled=False) mel matmul.
    mel = lax.dot_general(melw_ref[...], power,
                          (((1,), (1,)), ((), ())),
                          preferred_element_type=jnp.float32)
    out_ref[0] = (jnp.log(mel + 1e-5) + 4.5) * 0.2


# ----------------------------------------------------------------------------
# Wrapper
# ----------------------------------------------------------------------------

def augment_mel_stft_forward(x, *, n_mels, sr, win_length, hopsize, n_fft,
                             fmin, fmax, frames_per_tile=None,
                             dft_dtype=jnp.float32):
    """x: (B, T) float32 audio.  Returns (B, n_mels, n_frames), matching the torch
    module in eval mode.  dft_dtype=jnp.bfloat16 enables the bf16 DFT matmul (v5e win);
    the mel matmul always stays f32."""
    B, T = x.shape
    hop = hopsize
    w_np, melw_np, nfp, n_chunks = _build_constants(
        n_mels, sr, win_length, hopsize, n_fft, fmin, fmax)

    # Preemphasis ([-0.97, 1] valid conv) + centered reflect pad: cheap elementwise XLA
    # glue over the waveform (fused by XLA); framing itself happens inside the kernel.
    y = x[:, 1:] - 0.97 * x[:, :-1]                        # (B, T-1)
    L = y.shape[1]
    pad = n_fft // 2
    y_pad = jnp.pad(y, ((0, 0), (pad, pad)), mode="reflect")

    n_frames = 1 + L // hop
    if frames_per_tile is None:
        tf = 256 if n_frames >= 256 else 128
    else:
        tf = int(frames_per_tile)
    assert tf % 128 == 0, "frames_per_tile must be a multiple of 128"
    n_tiles = -(-n_frames // tf)
    frames_padded = n_tiles * tf

    # Hop-strided rows of the padded waveform: Yr[b, i, r] = y_pad[b, i*hop + r].
    # Zero-padded so every (TF, hop) block the kernel references (rows up to
    # (n_tiles + 1) * TF) is fully in bounds and divisible by the block shape.
    n_rows = _round_up(max((n_tiles + 1) * tf, -(-y_pad.shape[1] // hop)), tf)
    y_pad = jnp.pad(y_pad, ((0, 0), (0, n_rows * hop - y_pad.shape[1])))
    yr = y_pad.reshape(B, n_rows, hop)

    kernel = functools.partial(_melstft_kernel, tf=tf, hop=hop,
                               n_chunks=n_chunks, nfp=nfp)

    out = pl.pallas_call(
        kernel,
        out_shape=jax.ShapeDtypeStruct((B, n_mels, frames_padded), jnp.float32),
        grid=(B, n_tiles),
        in_specs=[
            # Two adjacent hop-row blocks of the SAME waveform array: frames that
            # straddle the tile boundary are covered without any dynamic slicing
            # and without materializing an overlapped frames tensor in HBM.
            pl.BlockSpec((1, tf, hop), lambda b, t: (b, t, 0)),
            pl.BlockSpec((1, tf, hop), lambda b, t: (b, t + 1, 0)),
            # Constants: whole-array residents in VMEM (single copy, no double buffer).
            pl.BlockSpec(memory_space=pltpu.MemorySpace.VMEM),
            pl.BlockSpec(memory_space=pltpu.MemorySpace.VMEM),
        ],
        out_specs=pl.BlockSpec((1, n_mels, tf), lambda b, t: (b, 0, t)),
        scratch_shapes=[pltpu.VMEM((2 * tf, hop), jnp.float32)],
        compiler_params=pltpu.CompilerParams(
            dimension_semantics=("parallel", "parallel"),
            vmem_limit_bytes=48 * 1024 * 1024),
    )(yr, yr, jnp.asarray(w_np, dft_dtype), jnp.asarray(melw_np, jnp.float32))

    if frames_padded != n_frames:
        out = out[:, :, :n_frames]
    return out


# ----------------------------------------------------------------------------
# Pure-JAX reference (untile/unfused version of the same eval-mode math)
# ----------------------------------------------------------------------------

def _reference_melspec(x, *, n_mels, sr, win_length, hopsize, n_fft, fmin, fmax):
    n_freq = n_fft // 2 + 1
    window = np.zeros(n_fft, dtype=np.float64)
    pad_l = (n_fft - win_length) // 2
    window[pad_l:pad_l + win_length] = hann_window_nonperiodic(win_length)
    n = np.arange(n_fft, dtype=np.float64)[:, None]
    k = np.arange(n_freq, dtype=np.float64)[None, :]
    ang = 2.0 * np.pi * n * k / n_fft
    cosm = jnp.asarray((window[:, None] * np.cos(ang)).astype(np.float32))
    sinm = jnp.asarray((window[:, None] * -np.sin(ang)).astype(np.float32))
    melb = np.zeros((n_mels, n_freq), dtype=np.float32)
    melb[:, :n_fft // 2] = kaldi_mel_banks(n_mels, n_fft, float(sr), float(fmin), float(fmax))
    melb = jnp.asarray(melb)

    y = x[:, 1:] - 0.97 * x[:, :-1]
    L = y.shape[1]
    y_pad = jnp.pad(y, ((0, 0), (n_fft // 2, n_fft // 2)), mode="reflect")
    n_frames = 1 + L // hopsize
    idx = np.arange(n_frames)[:, None] * hopsize + np.arange(n_fft)[None, :]
    frames = y_pad[:, idx]                                 # (B, n_frames, n_fft)
    re = jnp.einsum("bfn,nk->bfk", frames, cosm)
    im = jnp.einsum("bfn,nk->bfk", frames, sinm)
    power = re * re + im * im
    mel = jnp.einsum("mk,bfk->bmf", melb, power)
    return (jnp.log(mel + 1e-5) + 4.5) / 5.0


# TODO(synk): training-mode paths (random_rescale power exponent, fmin/fmax jitter,
# torchaudio Frequency/TimeMasking) are random augmentations; eval path is implemented.


if __name__ == "__main__":
    # Small but module-consistent configuration.
    n_mels = 16
    sr = 8000
    win_length = 64
    hopsize = 32
    n_fft = 128
    fmin = 0.0
    fmax_aug_range = 1000
    fmax = sr // 2 - fmax_aug_range // 2   # mirrors the "fmax is None" branch

    B, T = 2, 512
    key = jax.random.PRNGKey(0)
    x = jax.random.normal(key, (B, T), dtype=jnp.float32)

    mel = augment_mel_stft_forward(
        x, n_mels=n_mels, sr=sr, win_length=win_length, hopsize=hopsize,
        n_fft=n_fft, fmin=fmin, fmax=fmax)
    mel = jax.block_until_ready(mel)

    n_frames = 1 + (T - 1) // hopsize
    assert mel.shape == (B, n_mels, n_frames), mel.shape
    assert bool(jnp.all(jnp.isfinite(mel)))

    ref = _reference_melspec(
        x, n_mels=n_mels, sr=sr, win_length=win_length, hopsize=hopsize,
        n_fft=n_fft, fmin=fmin, fmax=fmax)
    max_err = float(jnp.max(jnp.abs(mel - ref)))
    assert max_err < 5e-2, f"kernel vs reference max abs err {max_err}"

    print("KERNEL_OK")
</pallas_src>

<mosaic_0001>
module attributes {stable_mosaic.version = 11 : i64} {
  func.func @_melstft_kernel(%arg0: i32, %arg1: i32, %arg2: memref<1x128x32xf32, #tpu.memory_space<vmem>>, %arg3: memref<1x128x32xf32, #tpu.memory_space<vmem>>, %arg4: memref<128x256xf32, #tpu.memory_space<vmem>>, %arg5: memref<16x128xf32, #tpu.memory_space<vmem>>, %arg6: memref<1x16x128xf32, #tpu.memory_space<vmem>>, %arg7: memref<256x32xf32, #tpu.memory_space<vmem>>) attributes {dimension_semantics = [#tpu.dimension_semantics<parallel>, #tpu.dimension_semantics<parallel>], iteration_bounds = array<i64: 2, 1>, scalar_prefetch = 0 : i64, scratch_operands = 1 : i64, tpu.core_type = #tpu.core_type<tc>, window_params = [{transform_indices = @transform_0, window_bounds = array<i64: 1, 128, 32>}, {transform_indices = @transform_1, window_bounds = array<i64: 1, 128, 32>}, {pipeline_mode = #tpu.pipeline_mode<synchronous>, transform_indices = @transform_2, window_bounds = array<i64: 128, 256>}, {pipeline_mode = #tpu.pipeline_mode<synchronous>, transform_indices = @transform_3, window_bounds = array<i64: 16, 128>}, {transform_indices = @transform_4, window_bounds = array<i64: 1, 16, 128>}]} {
    %c0 = arith.constant 0 : index
    %c0_0 = arith.constant 0 : index
    %c0_1 = arith.constant 0 : index
    %0 = vector.load %arg2[%c0, %c0_0, %c0_1] : memref<1x128x32xf32, #tpu.memory_space<vmem>>, vector<1x128x32xf32>
    %1 = vector.shape_cast %0 : vector<1x128x32xf32> to vector<128x32xf32>
    %c0_2 = arith.constant 0 : index
    %c0_3 = arith.constant 0 : index
    %2 = vector.load %arg7[%c0_2, %c0_3] : memref<256x32xf32, #tpu.memory_space<vmem>>, vector<128x32xf32>
    tpu.vector_store %arg7[%c0_2, %c0_3], %1 {strides = array<i32>} : memref<256x32xf32, #tpu.memory_space<vmem>>, vector<128x32xf32>,
    %c0_4 = arith.constant 0 : index
    %c0_5 = arith.constant 0 : index
    %c0_6 = arith.constant 0 : index
    %3 = vector.load %arg3[%c0_4, %c0_5, %c0_6] : memref<1x128x32xf32, #tpu.memory_space<vmem>>, vector<1x128x32xf32>
    %4 = vector.shape_cast %3 : vector<1x128x32xf32> to vector<128x32xf32>
    %c128 = arith.constant 128 : index
    %c0_7 = arith.constant 0 : index
    %5 = vector.load %arg7[%c128, %c0_7] : memref<256x32xf32, #tpu.memory_space<vmem>>, vector<128x32xf32>
    tpu.vector_store %arg7[%c128, %c0_7], %4 {strides = array<i32>} : memref<256x32xf32, #tpu.memory_space<vmem>>, vector<128x32xf32>,
    %cst = arith.constant 0.000000e+00 : f32
    %6 = vector.broadcast %cst : f32 to vector<128x256xf32>
    %c0_8 = arith.constant 0 : index
    %c0_9 = arith.constant 0 : index
    %7 = vector.load %arg7[%c0_8, %c0_9] : memref<256x32xf32, #tpu.memory_space<vmem>>, vector<128x32xf32>
    %c0_10 = arith.constant 0 : index
    %c0_11 = arith.constant 0 : index
    %8 = vector.load %arg4[%c0_10, %c0_11] : memref<128x256xf32, #tpu.memory_space<vmem>>, vector<32x256xf32>
    %cst_12 = arith.constant dense<0.000000e+00> : vector<128x256xf32>
    %9 = tpu.matmul %7, %8, %cst_12 {dimension_numbers = #tpu.dot_dimension_numbers<[1], [0], [0], [1], [0, 0, 1, 1], [], []>} : vector<128x32xf32>, vector<32x256xf32>, vector<128x256xf32> -> vector<128x256xf32>
    %10 = arith.addf %6, %9 : vector<128x256xf32>
    %c1 = arith.constant 1 : index
    %c0_13 = arith.constant 0 : index
    %11 = vector.load %arg7[%c1, %c0_13] : memref<256x32xf32, #tpu.memory_space<vmem>>, vector<128x32xf32>
    %c32 = arith.constant 32 : index
    %c0_14 = arith.constant 0 : index
    %12 = vector.load %arg4[%c32, %c0_14] : memref<128x256xf32, #tpu.memory_space<vmem>>, vector<32x256xf32>
    %cst_15 = arith.constant dense<0.000000e+00> : vector<128x256xf32>
    %13 = tpu.matmul %11, %12, %cst_15 {dimension_numbers = #tpu.dot_dimension_numbers<[1], [0], [0], [1], [0, 0, 1, 1], [], []>} : vector<128x32xf32>, vector<32x256xf32>, vector<128x256xf32> -> vector<128x256xf32>
    %14 = arith.addf %10, %13 : vector<128x256xf32>
    %c2 = arith.constant 2 : index
    %c0_16 = arith.constant 0 : index
    %15 = vector.load %arg7[%c2, %c0_16] : memref<256x32xf32, #tpu.memory_space<vmem>>, vector<128x32xf32>
    %c64 = arith.constant 64 : index
    %c0_17 = arith.constant 0 : index
    %16 = vector.load %arg4[%c64, %c0_17] : memref<128x256xf32, #tpu.memory_space<vmem>>, vector<32x256xf32>
    %cst_18 = arith.constant dense<0.000000e+00> : vector<128x256xf32>
    %17 = tpu.matmul %15, %16, %cst_18 {dimension_numbers = #tpu.dot_dimension_numbers<[1], [0], [0], [1], [0, 0, 1, 1], [], []>} : vector<128x32xf32>, vector<32x256xf32>, vector<128x256xf32> -> vector<128x256xf32>
    %18 = arith.addf %14, %17 : vector<128x256xf32>
    %c3 = arith.constant 3 : index
    %c0_19 = arith.constant 0 : index
    %19 = vector.load %arg7[%c3, %c0_19] : memref<256x32xf32, #tpu.memory_space<vmem>>, vector<128x32xf32>
    %c96 = arith.constant 96 : index
    %c0_20 = arith.constant 0 : index
    %20 = vector.load %arg4[%c96, %c0_20] : memref<128x256xf32, #tpu.memory_space<vmem>>, vector<32x256xf32>
    %cst_21 = arith.constant dense<0.000000e+00> : vector<128x256xf32>
    %21 = tpu.matmul %19, %20, %cst_21 {dimension_numbers = #tpu.dot_dimension_numbers<[1], [0], [0], [1], [0, 0, 1, 1], [], []>} : vector<128x32xf32>, vector<32x256xf32>, vector<128x256xf32> -> vector<128x256xf32>
    %22 = arith.addf %18, %21 : vector<128x256xf32>
    %23 = vector.extract_strided_slice %22 {offsets = [0, 0], sizes = [128, 128], strides = [1, 1]} : vector<128x256xf32> to vector<128x128xf32>
    %24 = vector.extract_strided_slice %22 {offsets = [0, 128], sizes = [128, 128], strides = [1, 1]} : vector<128x256xf32> to vector<128x128xf32>
    %25 = arith.mulf %23, %23 : vector<128x128xf32>
    %26 = arith.mulf %24, %24 : vector<128x128xf32>
    %27 = arith.addf %25, %26 : vector<128x128xf32>
    %c0_22 = arith.constant 0 : index
    %c0_23 = arith.constant 0 : index
    %28 = vector.load %arg5[%c0_22, %c0_23] : memref<16x128xf32, #tpu.memory_space<vmem>>, vector<16x128xf32>
    %cst_24 = arith.constant dense<0.000000e+00> : vector<16x128xf32>
    %29 = tpu.matmul %28, %27, %cst_24 {dimension_numbers = #tpu.dot_dimension_numbers<[1], [1], [0], [0], [0, 0, 1, 0], [], []>} : vector<16x128xf32>, vector<128x128xf32>, vector<16x128xf32> -> vector<16x128xf32>
    %cst_25 = arith.constant 9.99999974E-6 : f32
    %30 = vector.broadcast %cst_25 : f32 to vector<16x128xf32>
    %31 = arith.addf %29, %30 : vector<16x128xf32>
    %32 = math.log %31 : vector<16x128xf32>
    %cst_26 = arith.constant 4.500000e+00 : f32
    %33 = vector.broadcast %cst_26 : f32 to vector<16x128xf32>
    %34 = arith.addf %32, %33 : vector<16x128xf32>
    %cst_27 = arith.constant 2.000000e-01 : f32
    %35 = vector.broadcast %cst_27 : f32 to vector<16x128xf32>
    %36 = arith.mulf %34, %35 : vector<16x128xf32>
    %c0_28 = arith.constant 0 : index
    %c0_29 = arith.constant 0 : index
    %c0_30 = arith.constant 0 : index
    %37 = vector.load %arg6[%c0_28, %c0_29, %c0_30] : memref<1x16x128xf32, #tpu.memory_space<vmem>>, vector<1x16x128xf32>
    %38 = vector.shape_cast %37 : vector<1x16x128xf32> to vector<16x128xf32>
    %39 = vector.shape_cast %36 : vector<16x128xf32> to vector<1x16x128xf32>
    tpu.vector_store %arg6[%c0_28, %c0_29, %c0_30], %39 {strides = array<i32>} : memref<1x16x128xf32, #tpu.memory_space<vmem>>, vector<1x16x128xf32>,
    return
  }
  func.func @transform_0(%arg0: i32, %arg1: i32) -> (i32, i32, i32) {
    %c0_i32 = arith.constant 0 : i32
    %c0_i32_0 = arith.constant 0 : i32
    return %arg0, %arg1, %c0_i32 : i32, i32, i32
  }
  func.func @transform_1(%arg0: i32, %arg1: i32) -> (i32, i32, i32) {
    %c1_i32 = arith.constant 1 : i32
    %0 = arith.addi %arg1, %c1_i32 : i32
    %c0_i32 = arith.constant 0 : i32
    %c0_i32_0 = arith.constant 0 : i32
    return %arg0, %0, %c0_i32 : i32, i32, i32
  }
  func.func @transform_2(%arg0: i32, %arg1: i32) -> (i32, i32) {
    %c0_i32 = arith.constant 0 : i32
    %c0_i32_0 = arith.constant 0 : i32
    %c0_i32_1 = arith.constant 0 : i32
    return %c0_i32, %c0_i32_0 : i32, i32
  }
  func.func @transform_3(%arg0: i32, %arg1: i32) -> (i32, i32) {
    %c0_i32 = arith.constant 0 : i32
    %c0_i32_0 = arith.constant 0 : i32
    %c0_i32_1 = arith.constant 0 : i32
    return %c0_i32, %c0_i32_0 : i32, i32
  }
  func.func @transform_4(%arg0: i32, %arg1: i32) -> (i32, i32, i32) {
    %c0_i32 = arith.constant 0 : i32
    %c0_i32_0 = arith.constant 0 : i32
    return %arg0, %c0_i32, %arg1 : i32, i32, i32
  }
}

</mosaic_0001>

<bundles_post_ra>
// kernel: tpu_custom_call.1
= control target key start
LH: loop header
LB: loop body
LE: loop exit
PB: predicated region body
PF: predicated region fallthrough
CT: control target
= control target key end

     0   :  { %9 = vsyncpa [#allocation4], 0  ;;  %s2434_s0 = inlined_call_operand.vmem [shape: f32[2,256,32], index: 0, kind: input, shape index: {}]   ;;  %s2435_s1 = inlined_call_operand.vmem [shape: f32[2,256,32], index: 1, kind: input, shape index: {}]   ;;  %s2436_s2 = inlined_call_operand.vmem [shape: f32[128,256], index: 2, kind: input, shape index: {}]   ;;  %s2437_s3 = inlined_call_operand.vmem [shape: f32[16,128], index: 3, kind: input, shape index: {}]   ;;  %s2438_s4 = inlined_call_operand.hbm [shape: f32[2,16,128], index: 4, kind: output, shape index: {}]  }
   0x1   :  { %11 = vsyncpa [#allocation4 + $0x1], 0  ;;  %s2044_s15 = smov 0   ;;  %s2046_s16 = smov 0  }
   0x2   :  { %s2048_s17 = smov 0   ;;  %s2050_s18 = smov 0  }
   0x3   :  { %s2052_s19 = smov 0   ;;  %s2054_s20 = smov 0  }
   0x4 LB: > { %s1576_s21 = sadd.s32 4294967295, %s2013_s20   ;;  %s1577_s22 = sadd.s32 4294967294, %s2013_s20   ;;  %s2013_s20 = sphi %s2054_s20, %s17_s20   ;;  %s2009_s19 = sphi %s2052_s19, %s2445_s19   ;;  %s2005_s18 = sphi %s2050_s18, %s2444_s18   ;;  %s2001_s17 = sphi %s2048_s17, %s2443_s17   ;;  %s1997_s16 = sphi %s2046_s16, %s2442_s16   ;;  %s1993_s15 = sphi %s2044_s15, %s2441_s15  }
   0x5   : > { %s29_s23 = sadd.s32 1, %s2009_s19  ;;  %s138_s24 = sadd.s32 1, %s2001_s17 }
   0x6   : > { %p31_p0 = scmp.ge.s32.totalorder %s29_s23, 2  ;;  %p148_p1 = scmp.ne.s32.totalorder %s2001_s17, %s1997_s16 }
   0x7   : > { %p149_p2 = scmp.eq.s32.totalorder %s1576_s21, 1  ;;  %p154_p3 = scmp.ne.s32.totalorder %s1997_s16, %s1993_s15 }
   0x8   : > { %s2447_s23 = smov (%p31_p0, %s29_s23), 0  ;;  %p155_p5 = scmp.eq.s32.totalorder %s1577_s22, 1 }
   0x9   : > { %p2084_p4 = por %p149_p2, %p148_p1  ;;  %s133_s26 = ssub.s32 %s2009_s19, %s2447_s23 }
   0xa   : > { %p1580_p6 = scmp.ge.s32.totalorder %s2013_s20, 1  ;;  %p136_p7 = scmp.eq.s32.totalorder %s133_s26, 0 }
   0xb   : > { %p2091_p8 = por %p155_p5, %p154_p3  ;;  %p207_p9 = scmp.lt.s32.totalorder %s2013_s20, 3 }
   0xc   : > { %s2097_s28 = scalar_select %p136_p7, %s2001_s17, %s138_s24  }
   0xd   : > { %p208_p10 = pnand %p1580_p6, %p207_p9 }
   0xe   : > { %v375_v0 = vld [vmem:[%s2436_s2 + $0x48] sm:$0xff] (!%p208_p10)  ;;  %v377_v1 = vld [vmem:[%s2436_s2 + $0x58] sm:$0xff] (!%p208_p10)  ;;  %p248_p11 = scmp.lt.s32.totalorder (!%p208_p10), %s2005_s18, 1  ;;  %v374_v5 = vld [vmem:[%s2436_s2 + $0x40] sm:$0xff] (!%p208_p10)  ;;  %v2015_v7 = vmov (!%p208_p10), 0.0   ;;  %vm285_vm0 = vcmask (!%p208_p10), 261120  }
   0xf   : > { %211 = sbr.rel (%p208_p10) target bundleno = 636 (0x27c), region = 36  ;;  %v817_v2 = vld [vmem:[%s2436_s2 + $0x88] sm:$0xff] (!%p208_p10)  ;;  %v1713_v3 = vpack.c.bf16 (!%p208_p10), %v377_v1, %v375_v0  ;;  %v819_v4 = vld [vmem:[%s2436_s2 + $0x98] sm:$0xff] (!%p208_p10)  ;;  %v376_v6 = vld [vmem:[%s2436_s2 + $0x50] sm:$0xff] (!%p208_p10)  ;;  %494 = vmatprep.mubr.f32.mxu1 (!%p208_p10), %v2015_v7  ;;  %936 = vmatprep.mubr.f32.mxu0 (!%p208_p10), %v2015_v7  ;;  %s244_s6 = sand.u32 (!%p208_p10), 1, %s1997_s16  }
  0x10   : > { %v1729_v8 = vpack.c.bf16 (!%p208_p10), %v819_v4, %v817_v2  ;;  %v1715_v9 = vpack.c.bf16 (!%p208_p10), %v376_v6, %v374_v5  ;;  %v816_v10 = vld [vmem:[%s2436_s2 + $0x80] sm:$0xff] (!%p208_p10)  ;;  %v818_v11 = vld [vmem:[%s2436_s2 + $0x90] sm:$0xff] (!%p208_p10)  ;;  %v379_v12 = vld [vmem:[%s2436_s2 + $0x68] sm:$0xff] (!%p208_p10)  ;;  %s1581_s7 = sshll.u32 (!%p208_p10), %s244_s6, 4  ;;  %s1658_s11 = sshll.u32 (!%p208_p10), %s2005_s18, 8 }
  0x11   : > { %1714 = vmatprep.subr.bf16.mxu1 (!%p208_p10), %v1713_v3  ;;  %v1731_v13 = vpack.c.bf16 (!%p208_p10), %v818_v11, %v816_v10  ;;  %v381_v14 = vld [vmem:[%s2436_s2 + $0x78] sm:$0xff] (!%p208_p10)  ;;  %v821_v15 = vld [vmem:[%s2436_s2 + $0xa8] sm:$0xff] (!%p208_p10)  ;;  %v378_v19 = vld [vmem:[%s2436_s2 + $0x60] sm:$0xff] (!%p208_p10)  ;;  %s246_s9 = scalar_lea.vmem (!%p208_p10), [#allocation3], %s1581_s7  ;;  %s2386_s14 = scalar_lea.hbm (!%p208_p10), %s2438_s4, %s1658_s11 }
  0x12   : > { %v823_v16 = vld [vmem:[%s2436_s2 + $0xb8] sm:$0xff] (!%p208_p10)  ;;  %1730 = vmatprep.subr.bf16.mxu0 (!%p208_p10), %v1729_v8  ;;  %1716 = vmatpush1.bf16.msra.mxu1 (!%p208_p10), %v1715_v9  ;;  %v1717_v17 = vpack.c.bf16 (!%p208_p10), %v381_v14, %v379_v12  ;;  %v380_v20 = vld [vmem:[%s2436_s2 + $0x70] sm:$0xff] (!%p208_p10)  ;;  %v820_v21 = vld [vmem:[%s2436_s2 + $0xa0] sm:$0xff] (!%p208_p10)  ;;  %s1480_s10 = sshll.u32 (!%p208_p10), %s246_s9, 4  ;;  %s2381_s10 = int_to_ptr.vmem [resolvable:$true] %s1480_s10 }
  0x13   : > { %v1733_v18 = vpack.c.bf16 (!%p208_p10), %v823_v16, %v821_v15  ;;  %1732 = vmatpush1.bf16.msra.mxu0 (!%p208_p10), %v1731_v13  ;;  %v1719_v22 = vpack.c.bf16 (!%p208_p10), %v380_v20, %v378_v19  ;;  %v822_v23 = vld [vmem:[%s2436_s2 + $0xb0] sm:$0xff] (!%p208_p10)  ;;  %v351_v24 = vld [vmem:[%s2436_s2 + $0x8] sm:$0xff] (!%p208_p10)  ;;  %v353_v25 = vld [vmem:[%s2436_s2 + $0x18] sm:$0xff] (!%p208_p10)  ;;  %s1935_s22 = scalar_lea.vmem (!%p208_p10), %s2381_s10, 256 }
  0x14   : > { %1718 = vmatprep.subr.bf16.mxu1 (!%p208_p10), %v1717_v17  ;;  %v1735_v26 = vpack.c.bf16 (!%p208_p10), %v822_v23, %v820_v21  ;;  %v1721_v29 = vpack.c.bf16 (!%p208_p10), %v353_v25, %v351_v24  ;;  %v1082_v30 = vld [vmem:[%s2436_s2 + $0xc8] sm:$0xff] (!%p208_p10)  ;;  %v1084_v31 = vld [vmem:[%s2436_s2 + $0xd8] sm:$0xff] (!%p208_p10)  ;;  %v350_v32 = vld [vmem:[%s2436_s2] sm:$0xff] (!%p208_p10)  ;;  %p1936_p12 = scmp.ne.s32.totalorder (!%p208_p10), %s2381_s10, %s1935_s22 }
  0x15   : > { %1734 = vmatprep.subr.bf16.mxu0 (!%p208_p10), %v1733_v18  ;;  %v352_v33 = vld [vmem:[%s2436_s2 + $0x10] sm:$0xff] (!%p208_p10)  ;;  %v1737_v34 = vpack.c.bf16 (!%p208_p10), %v1084_v31, %v1082_v30  ;;  %v1081_v35 = vld [vmem:[%s2436_s2 + $0xc0] sm:$0xff] (!%p208_p10)  ;;  %v355_v45 = vld [vmem:[%s2436_s2 + $0x28] sm:$0xff] (!%p208_p10) }
  0x16   : > { %s2130_s5 = scalar_select %p248_p11, %s2005_s18, 1  ;;  %1720 = vmatpush1.bf16.msra.mxu1 %v1719_v22  ;;  %v1083_v36 = vld [vmem:[%s2436_s2 + $0xd0] sm:$0xff]  ;;  %v357_v46 = vld [vmem:[%s2436_s2 + $0x38] sm:$0xff]  ;;  %v1723_v47 = vpack.c.bf16 %v352_v33, %v350_v32  ;;  %v1086_v49 = vld [vmem:[%s2436_s2 + $0xe8] sm:$0xff] }
  0x17   : > { %1736 = vmatpush1.bf16.msra.mxu0 %v1735_v26  ;;  %1722 = vmatprep.subr.bf16.mxu1 %v1721_v29  ;;  %v1739_v48 = vpack.c.bf16 %v1083_v36, %v1081_v35  ;;  %v1088_v50 = vld [vmem:[%s2436_s2 + $0xf8] sm:$0xff]  ;;  %v354_v51 = vld [vmem:[%s2436_s2 + $0x20] sm:$0xff]  ;;  %v356_v52 = vld [vmem:[%s2436_s2 + $0x30] sm:$0xff]  ;;  %v1725_v57 = vpack.c.bf16 %v357_v46, %v355_v45  ;;  %p1937_p13 = pnand %p1936_p12, %p2084_p4  ;;  %s2016_s18 = smov [#allocation3]  }
  0x18   : > { %s1655_s26 = sshll.u32 %s2130_s5, 8  ;;  %1738 = vmatprep.subr.bf16.mxu0 %v1737_v34  ;;  %v1085_v53 = vld [vmem:[%s2436_s2 + $0xe0] sm:$0xff]  ;;  %v1087_v54 = vld [vmem:[%s2436_s2 + $0xf0] sm:$0xff]  ;;  %v1741_v58 = vpack.c.bf16 %v1088_v50, %v1086_v49  ;;  %v1727_v2 = vpack.c.bf16 %v356_v52, %v354_v51  ;;  %s1939_s24 = sshll.u32 %s2016_s18, 4  ;;  %s1940_s24 = int_to_ptr.vmem [resolvable:$false] %s1939_s24 }
  0x19   : > { %s2159_s8 = scalar_lea.vmem %s2434_s0, %s1655_s26  ;;  %s1657_s21 = sadd.s32 128, %s1655_s26  ;;  %v1743_v3 = vpack.c.bf16 %v1087_v54, %v1085_v53 }
  0x1a   : > { %v269_v27 = vld [vmem:[%s2159_s8] sm:$0xff]  ;;  %v270_v28 = vld [vmem:[%s2159_s8 + $0x8] sm:$0xff]  ;;  %v271_v37 = vld [vmem:[%s2159_s8 + $0x10] sm:$0xff]  ;;  %s266_s5 = scalar_lea.vmem %s2435_s1, %s1657_s21  ;;  %s2388_s21 = scalar_lea.sflag [#allocation4], %s244_s6 }
  0x1b   : > { %286 = vst.msk [vmem:[#allocation2] sm:$0xff] %vm285_vm0, %v269_v27  ;;  %287 = vst.msk [vmem:[#allocation2 + $0x8] sm:$0xff] %vm285_vm0, %v270_v28  ;;  %v272_v38 = vld [vmem:[%s2159_s8 + $0x18] sm:$0xff]  ;;  %v273_v39 = vld [vmem:[%s2159_s8 + $0x20] sm:$0xff]  ;;  %p1938_p0 = pneg %p1937_p13  ;;  %p1942_p1 = scmp.lt.s32.totalorder %s2381_s10, %s1940_s24 }
  0x1c   : > { %288 = vst.msk [vmem:[#allocation2 + $0x10] sm:$0xff] %vm285_vm0, %v271_v37  ;;  %v274_v40 = vld [vmem:[%s2159_s8 + $0x28] sm:$0xff]  ;;  %289 = vst.msk [vmem:[#allocation2 + $0x18] sm:$0xff] %vm285_vm0, %v272_v38  ;;  %v275_v41 = vld [vmem:[%s2159_s8 + $0x30] sm:$0xff] }
  0x1d   : > { %290 = vst.msk [vmem:[#allocation2 + $0x20] sm:$0xff] %vm285_vm0, %v273_v39  ;;  %291 = vst.msk [vmem:[#allocation2 + $0x28] sm:$0xff] %vm285_vm0, %v274_v40  ;;  %v276_v42 = vld [vmem:[%s2159_s8 + $0x38] sm:$0xff]  ;;  %v277_v43 = vld [vmem:[%s2159_s8 + $0x40] sm:$0xff] }
  0x1e   : > { %292 = vst.msk [vmem:[#allocation2 + $0x30] sm:$0xff] %vm285_vm0, %v275_v41  ;;  %293 = vst.msk [vmem:[#allocation2 + $0x38] sm:$0xff] %vm285_vm0, %v276_v42  ;;  %v278_v44 = vld [vmem:[%s2159_s8 + $0x48] sm:$0xff]  ;;  %v279_v59 = vld [vmem:[%s2159_s8 + $0x50] sm:$0xff] }
  0x1f   : > { %294 = vst.msk [vmem:[#allocation2 + $0x40] sm:$0xff] %vm285_vm0, %v277_v43  ;;  %295 = vst.msk [vmem:[#allocation2 + $0x48] sm:$0xff] %vm285_vm0, %v278_v44  ;;  %v280_v60 = vld [vmem:[%s2159_s8 + $0x58] sm:$0xff]  ;;  %v281_v61 = vld [vmem:[%s2159_s8 + $0x60] sm:$0xff] }
  0x20   : > { %296 = vst.msk [vmem:[#allocation2 + $0x50] sm:$0xff] %vm285_vm0, %v279_v59  ;;  %v282_v62 = vld [vmem:[%s2159_s8 + $0x68] sm:$0xff]  ;;  %297 = vst.msk [vmem:[#allocation2 + $0x58] sm:$0xff] %vm285_vm0, %v280_v60  ;;  %v283_v1 = vld [vmem:[%s2159_s8 + $0x70] sm:$0xff] }
  0x21   : > { %298 = vst.msk [vmem:[#allocation2 + $0x60] sm:$0xff] %vm285_vm0, %v281_v61  ;;  %299 = vst.msk [vmem:[#allocation2 + $0x68] sm:$0xff] %vm285_vm0, %v282_v62  ;;  %v284_v6 = vld [vmem:[%s2159_s8 + $0x78] sm:$0xff]  ;;  %v302_v8 = vld [vmem:[%s266_s5] sm:$0xff]  ;;  %s1941_s5 = scalar_lea.vmem %s1940_s24, 512 }
  0x22   : > { %v358_v55 = vld [vmem:[#allocation2 + $0x1] sm:$0xff]  ;;  %300 = vst.msk [vmem:[#allocation2 + $0x70] sm:$0xff] %vm285_vm0, %v283_v1  ;;  %301 = vst.msk [vmem:[#allocation2 + $0x78] sm:$0xff] %vm285_vm0, %v284_v6  ;;  %p1943_p2 = scmp.lt.s32.totalorder %s1941_s5, %s1935_s22 }
  0x23   : > { %v800_v56 = vld [vmem:[#allocation2 + $0x2] sm:$0xff]  ;;  %1586 = vmatmul.mubr.msk.f32.vlgmr.msra.gmra.mrb[0].mxu1 %vm285_vm0, %v358_v55  ;;  %v801_v0 = vld [vmem:[#allocation2 + $0xa] sm:$0xff]  ;;  %v802_v5 = vld [vmem:[#allocation2 + $0x12] sm:$0xff]  ;;  %318 = vst.msk [vmem:[#allocation2 + $0x80] sm:$0xff] %vm285_vm0, %v302_v8 }
  0x24   : > { %1618 = vmatmul.mubr.msk.f32.vlgmr.msra.gmra.mrb[0].mxu0 %vm285_vm0, %v800_v56  ;;  %1724 = vmatpush1.bf16.msra.mxu1 %v1723_v47  ;;  %v359_v63 = vld [vmem:[#allocation2 + $0x9] sm:$0xff]  ;;  %v360_v4 = vld [vmem:[#allocation2 + $0x11] sm:$0xff]  ;;  %v361_v9 = vld [vmem:[#allocation2 + $0x19] sm:$0xff]  ;;  %p1944_p3 = por %p1943_p2, %p1942_p1 }
  0x25   : > { %1740 = vmatpush1.bf16.msra.mxu0 %v1739_v48  ;;  %500 = vmatprep.mubr.f32.mxu1 %v2015_v7  ;;  %v803_v10 = vld [vmem:[#allocation2 + $0x1a] sm:$0xff]  ;;  %v804_v12 = vld [vmem:[#allocation2 + $0x22] sm:$0xff]  ;;  %v805_v14 = vld [vmem:[#allocation2 + $0x2a] sm:$0xff] }
  0x26   : > { %942 = vmatprep.mubr.f32.mxu0 %v2015_v7  ;;  %1726 = vmatprep.subr.bf16.mxu1 %v1725_v57  ;;  %v362_v11 = vld [vmem:[#allocation2 + $0x21] sm:$0xff]  ;;  %v363_v13 = vld [vmem:[#allocation2 + $0x29] sm:$0xff]  ;;  %v364_v15 = vld [vmem:[#allocation2 + $0x31] sm:$0xff]  ;;  %p1945_p5 = pnand %p1944_p3, %p1938_p0 }
  0x27   : > { %1742 = vmatprep.subr.bf16.mxu0 %v1741_v58  ;;  %1587 = vmatmul.mubr.msk.f32.gmra.mrb[2].mxu1 %vm285_vm0, %v359_v63  ;;  %v806_v16 = vld [vmem:[#allocation2 + $0x32] sm:$0xff]  ;;  %v807_v18 = vld [vmem:[#allocation2 + $0x3a] sm:$0xff]  ;;  %v808_v20 = vld [vmem:[#allocation2 + $0x42] sm:$0xff] }
  0x28   : > { %1619 = vmatmul.mubr.msk.f32.gmra.mrb[2].mxu0 %vm285_vm0, %v801_v0  ;;  %506 = vmatprep.mubr.f32.mxu1 %v2015_v7  ;;  %v365_v17 = vld [vmem:[#allocation2 + $0x39] sm:$0xff]  ;;  %v366_v19 = vld [vmem:[#allocation2 + $0x41] sm:$0xff]  ;;  %v367_v21 = vld [vmem:[#allocation2 + $0x49] sm:$0xff] }
  0x29   : > { %948 = vmatprep.mubr.f32.mxu0 %v2015_v7  ;;  %1728 = vmatpush1.bf16.msra.mxu1 %v1727_v2  ;;  %v809_v22 = vld [vmem:[#allocation2 + $0x4a] sm:$0xff]  ;;  %v810_v24 = vld [vmem:[#allocation2 + $0x52] sm:$0xff]  ;;  %v811_v26 = vld [vmem:[#allocation2 + $0x5a] sm:$0xff] }
  0x2a   : > { %1744 = vmatpush1.bf16.msra.mxu0 %v1743_v3  ;;  %v368_v23 = vld [vmem:[#allocation2 + $0x51] sm:$0xff]  ;;  %v369_v25 = vld [vmem:[#allocation2 + $0x59] sm:$0xff]  ;;  %v370_v27 = vld [vmem:[#allocation2 + $0x61] sm:$0xff] }
  0x2b   : > { %1588 = vmatmul.mubr.msk.f32.gmra.mrb[4].mxu1 %vm285_vm0, %v360_v4  ;;  %v812_v28 = vld [vmem:[#allocation2 + $0x62] sm:$0xff]  ;;  %v813_v30 = vld [vmem:[#allocation2 + $0x6a] sm:$0xff]  ;;  %v814_v32 = vld [vmem:[#allocation2 + $0x72] sm:$0xff] }
  0x2c   : > { %1620 = vmatmul.mubr.msk.f32.gmra.mrb[4].mxu0 %vm285_vm0, %v802_v5  ;;  %512 = vmatprep.mubr.f32.mxu1 %v2015_v7  ;;  %v371_v29 = vld [vmem:[#allocation2 + $0x69] sm:$0xff]  ;;  %v372_v31 = vld [vmem:[#allocation2 + $0x71] sm:$0xff]  ;;  %v373_v33 = vld [vmem:[#allocation2 + $0x79] sm:$0xff] }
  0x2d   : > { %954 = vmatprep.mubr.f32.mxu0 %v2015_v7  ;;  %v815_v34 = vld [vmem:[#allocation2 + $0x7a] sm:$0xff]  ;;  %v1065_v36 = vld [vmem:[#allocation2 + $0x3] sm:$0xff]  ;;  %v1066_v38 = vld [vmem:[#allocation2 + $0xb] sm:$0xff] }
  0x2e   : > { %v334_v35 = vld [vmem:[#allocation2] sm:$0xff]  ;;  %v335_v37 = vld [vmem:[#allocation2 + $0x8] sm:$0xff]  ;;  %v336_v39 = vld [vmem:[#allocation2 + $0x10] sm:$0xff] }
  0x2f   : > { %1589 = vmatmul.mubr.msk.f32.gmra.mrb[6].mxu1 %vm285_vm0, %v361_v9  ;;  %v1067_v40 = vld [vmem:[#allocation2 + $0x13] sm:$0xff]  ;;  %v1068_v42 = vld [vmem:[#allocation2 + $0x1b] sm:$0xff]  ;;  %v1069_v44 = vld [vmem:[#allocation2 + $0x23] sm:$0xff] }
  0x30   : > { %1621 = vmatmul.mubr.msk.f32.gmra.mrb[6].mxu0 %vm285_vm0, %v803_v10  ;;  %518 = vmatprep.mubr.f32.mxu1 %v2015_v7  ;;  %v337_v41 = vld [vmem:[#allocation2 + $0x18] sm:$0xff]  ;;  %v338_v43 = vld [vmem:[#allocation2 + $0x20] sm:$0xff]  ;;  %v339_v45 = vld [vmem:[#allocation2 + $0x28] sm:$0xff] }
  0x31   : > { %960 = vmatprep.mubr.f32.mxu0 %v2015_v7  ;;  %v1070_v46 = vld [vmem:[#allocation2 + $0x2b] sm:$0xff]  ;;  %v1071_v48 = vld [vmem:[#allocation2 + $0x33] sm:$0xff]  ;;  %v1072_v50 = vld [vmem:[#allocation2 + $0x3b] sm:$0xff] }
  0x32   : > { %v340_v47 = vld [vmem:[#allocation2 + $0x30] sm:$0xff]  ;;  %v341_v49 = vld [vmem:[#allocation2 + $0x38] sm:$0xff]  ;;  %v342_v51 = vld [vmem:[#allocation2 + $0x40] sm:$0xff] }
  0x33   : > { %1590 = vmatmul.mubr.msk.f32.gmra.mrb[8].mxu1 %vm285_vm0, %v362_v11  ;;  %v1073_v52 = vld [vmem:[#allocation2 + $0x43] sm:$0xff]  ;;  %v1074_v54 = vld [vmem:[#allocation2 + $0x4b] sm:$0xff]  ;;  %v1075_v56 = vld [vmem:[#allocation2 + $0x53] sm:$0xff] }
  0x34   : > { %1622 = vmatmul.mubr.msk.f32.gmra.mrb[8].mxu0 %vm285_vm0, %v804_v12  ;;  %524 = vmatprep.mubr.f32.mxu1 %v2015_v7  ;;  %v343_v53 = vld [vmem:[#allocation2 + $0x48] sm:$0xff]  ;;  %v344_v55 = vld [vmem:[#allocation2 + $0x50] sm:$0xff]  ;;  %v345_v57 = vld [vmem:[#allocation2 + $0x58] sm:$0xff] }
  0x35   : > { %966 = vmatprep.mubr.f32.mxu0 %v2015_v7  ;;  %v1076_v58 = vld [vmem:[#allocation2 + $0x5b] sm:$0xff]  ;;  %v1077_v60 = vld [vmem:[#allocation2 + $0x63] sm:$0xff]  ;;  %v1078_v62 = vld [vmem:[#allocation2 + $0x6b] sm:$0xff] }
  0x36   : > { %v346_v59 = vld [vmem:[#allocation2 + $0x60] sm:$0xff]  ;;  %v347_v61 = vld [vmem:[#allocation2 + $0x68] sm:$0xff]  ;;  %v348_v63 = vld [vmem:[#allocation2 + $0x70] sm:$0xff] }
  0x37   : > { %1591 = vmatmul.mubr.msk.f32.gmra.mrb[10].mxu1 %vm285_vm0, %v363_v13  ;;  %v1079_v0 = vld [vmem:[#allocation2 + $0x73] sm:$0xff]  ;;  %v1080_v2 = vld [vmem:[#allocation2 + $0x7b] sm:$0xff] }
  0x38   : > { %1623 = vmatmul.mubr.msk.f32.gmra.mrb[10].mxu0 %vm285_vm0, %v805_v14  ;;  %530 = vmatprep.mubr.f32.mxu1 %v2015_v7  ;;  %v349_v1 = vld [vmem:[#allocation2 + $0x78] sm:$0xff]  ;;  %v1378_v3 = vld [vmem:[%s2437_s3] sm:$0xff] }
  0x39   : > { %972 = vmatprep.mubr.f32.mxu0 %v2015_v7 }
  0x3b   : > { %1592 = vmatmul.mubr.msk.f32.gmra.mrb[12].mxu1 %vm285_vm0, %v364_v15 }
  0x3c   : > { %1624 = vmatmul.mubr.msk.f32.gmra.mrb[12].mxu0 %vm285_vm0, %v806_v16  ;;  %536 = vmatprep.mubr.f32.mxu1 %v2015_v7 }
  0x3d   : > { %978 = vmatprep.mubr.f32.mxu0 %v2015_v7 }
  0x3f   : > { %1593 = vmatmul.mubr.msk.f32.gmra.mrb[14].mxu1 %vm285_vm0, %v365_v17 }
  0x40   : > { %1625 = vmatmul.mubr.msk.f32.gmra.mrb[14].mxu0 %vm285_vm0, %v807_v18  ;;  %542 = vmatprep.mubr.f32.mxu1 %v2015_v7 }
  0x41   : > { %984 = vmatprep.mubr.f32.mxu0 %v2015_v7 }
  0x43   : > { %1594 = vmatmul.mubr.msk.f32.gmra.mrb[16].mxu1 %vm285_vm0, %v366_v19 }
  0x44   : > { %1626 = vmatmul.mubr.msk.f32.gmra.mrb[16].mxu0 %vm285_vm0, %v808_v20  ;;  %548 = vmatprep.mubr.f32.mxu1 %v2015_v7 }
  0x45   : > { %990 = vmatprep.mubr.f32.mxu0 %v2015_v7 }
  0x47   : > { %1595 = vmatmul.mubr.msk.f32.gmra.mrb[18].mxu1 %vm285_vm0, %v367_v21 }
  0x48   : > { %1627 = vmatmul.mubr.msk.f32.gmra.mrb[18].mxu0 %vm285_vm0, %v809_v22  ;;  %554 = vmatprep.mubr.f32.mxu1 %v2015_v7 }
  0x49   : > { %996 = vmatprep.mubr.f32.mxu0 %v2015_v7 }
  0x4b   : > { %1596 = vmatmul.mubr.msk.f32.gmra.mrb[20].mxu1 %vm285_vm0, %v368_v23 }
  0x4c   : > { %1628 = vmatmul.mubr.msk.f32.gmra.mrb[20].mxu0 %vm285_vm0, %v810_v24  ;;  %560 = vmatprep.mubr.f32.mxu1 %v2015_v7 }
  0x4d   : > { %1002 = vmatprep.mubr.f32.mxu0 %v2015_v7 }
  0x4f   : > { %1597 = vmatmul.mubr.msk.f32.gmra.mrb[22].mxu1 %vm285_vm0, %v369_v25 }
  0x50   : > { %1629 = vmatmul.mubr.msk.f32.gmra.mrb[22].mxu0 %vm285_vm0, %v811_v26  ;;  %566 = vmatprep.mubr.f32.mxu1 %v2015_v7 }
  0x51   : > { %1008 = vmatprep.mubr.f32.mxu0 %v2015_v7 }
  0x53   : > { %1598 = vmatmul.mubr.msk.f32.gmra.mrb[24].mxu1 %vm285_vm0, %v370_v27 }
  0x54   : > { %1630 = vmatmul.mubr.msk.f32.gmra.mrb[24].mxu0 %vm285_vm0, %v812_v28  ;;  %572 = vmatprep.mubr.f32.mxu1 %v2015_v7 }
  0x55   : > { %1014 = vmatprep.mubr.f32.mxu0 %v2015_v7 }
  0x57   : > { %1599 = vmatmul.mubr.msk.f32.gmra.mrb[26].mxu1 %vm285_vm0, %v371_v29 }
  0x58   : > { %1631 = vmatmul.mubr.msk.f32.gmra.mrb[26].mxu0 %vm285_vm0, %v813_v30  ;;  %578 = vmatprep.mubr.f32.mxu1 %v2015_v7 }
  0x59   : > { %1020 = vmatprep.mubr.f32.mxu0 %v2015_v7 }
  0x5b   : > { %1600 = vmatmul.mubr.msk.f32.gmra.mrb[28].mxu1 %vm285_vm0, %v372_v31 }
  0x5c   : > { %1632 = vmatmul.mubr.msk.f32.gmra.mrb[28].mxu0 %vm285_vm0, %v814_v32  ;;  %584 = vmatprep.mubr.f32.mxu1 %v2015_v7 }
  0x5d   : > { %1026 = vmatprep.mubr.f32.mxu0 %v2015_v7 }
  0x5f   : > { %1601 = vmatmul.mubr.msk.f32.gmra.mrb[30].mxu1 %vm285_vm0, %v373_v33 }
  0x60   : > { %1633 = vmatmul.mubr.msk.f32.gmra.mrb[30].mxu0 %vm285_vm0, %v815_v34  ;;  %703 = vmatprep.mubr.f32.mxu1 %v2015_v7 }
  0x61   : > { %1201 = vmatprep.mubr.f32.mxu0 %v2015_v7 }
  0x63   : > { %1602 = vmatmul.mubr.msk.f32.vlgmr.msra.gmra.mrb[0].mxu1 %vm285_vm0, %v334_v35 }
  0x64   : > { %1634 = vmatmul.mubr.msk.f32.vlgmr.msra.gmra.mrb[0].mxu0 %vm285_vm0, %v1065_v36  ;;  %709 = vmatprep.mubr.f32.mxu1 %v2015_v7 }
  0x65   : > { %1207 = vmatprep.mubr.f32.mxu0 %v2015_v7 }
  0x67   : > { %1603 = vmatmul.mubr.msk.f32.gmra.mrb[2].mxu1 %vm285_vm0, %v335_v37 }
  0x68   : > { %1635 = vmatmul.mubr.msk.f32.gmra.mrb[2].mxu0 %vm285_vm0, %v1066_v38  ;;  %715 = vmatprep.mubr.f32.mxu1 %v2015_v7 }
  0x69   : > { %1213 = vmatprep.mubr.f32.mxu0 %v2015_v7 }
  0x6b   : > { %1604 = vmatmul.mubr.msk.f32.gmra.mrb[4].mxu1 %vm285_vm0, %v336_v39 }
  0x6c   : > { %1636 = vmatmul.mubr.msk.f32.gmra.mrb[4].mxu0 %vm285_vm0, %v1067_v40  ;;  %721 = vmatprep.mubr.f32.mxu1 %v2015_v7 }
  0x6d   : > { %1219 = vmatprep.mubr.f32.mxu0 %v2015_v7 }
  0x6f   : > { %1605 = vmatmul.mubr.msk.f32.gmra.mrb[6].mxu1 %vm285_vm0, %v337_v41 }
  0x70   : > { %1637 = vmatmul.mubr.msk.f32.gmra.mrb[6].mxu0 %vm285_vm0, %v1068_v42  ;;  %727 = vmatprep.mubr.f32.mxu1 %v2015_v7 }
  0x71   : > { %1225 = vmatprep.mubr.f32.mxu0 %v2015_v7 }
  0x73   : > { %1606 = vmatmul.mubr.msk.f32.gmra.mrb[8].mxu1 %vm285_vm0, %v338_v43 }
  0x74   : > { %1638 = vmatmul.mubr.msk.f32.gmra.mrb[8].mxu0 %vm285_vm0, %v1069_v44  ;;  %733 = vmatprep.mubr.f32.mxu1 %v2015_v7 }
  0x75   : > { %1231 = vmatprep.mubr.f32.mxu0 %v2015_v7 }
  0x77   : > { %1607 = vmatmul.mubr.msk.f32.gmra.mrb[10].mxu1 %vm285_vm0, %v339_v45 }
  0x78   : > { %1639 = vmatmul.mubr.msk.f32.gmra.mrb[10].mxu0 %vm285_vm0, %v1070_v46  ;;  %739 = vmatprep.mubr.f32.mxu1 %v2015_v7 }
  0x79   : > { %1237 = vmatprep.mubr.f32.mxu0 %v2015_v7 }
  0x7b   : > { %1608 = vmatmul.mubr.msk.f32.gmra.mrb[12].mxu1 %vm285_vm0, %v340_v47 }
  0x7c   : > { %1640 = vmatmul.mubr.msk.f32.gmra.mrb[12].mxu0 %vm285_vm0, %v1071_v48  ;;  %745 = vmatprep.mubr.f32.mxu1 %v2015_v7 }
  0x7d   : > { %1243 = vmatprep.mubr.f32.mxu0 %v2015_v7 }
  0x7f   : > { %1609 = vmatmul.mubr.msk.f32.gmra.mrb[14].mxu1 %vm285_vm0, %v341_v49 }
  0x80   : > { %1641 = vmatmul.mubr.msk.f32.gmra.mrb[14].mxu0 %vm285_vm0, %v1072_v50  ;;  %751 = vmatprep.mubr.f32.mxu1 %v2015_v7 }
  0x81   : > { %1249 = vmatprep.mubr.f32.mxu0 %v2015_v7 }
  0x83   : > { %1610 = vmatmul.mubr.msk.f32.gmra.mrb[16].mxu1 %vm285_vm0, %v342_v51 }
  0x84   : > { %1642 = vmatmul.mubr.msk.f32.gmra.mrb[16].mxu0 %vm285_vm0, %v1073_v52  ;;  %757 = vmatprep.mubr.f32.mxu1 %v2015_v7 }
  0x85   : > { %1255 = vmatprep.mubr.f32.mxu0 %v2015_v7 }
  0x87   : > { %1611 = vmatmul.mubr.msk.f32.gmra.mrb[18].mxu1 %vm285_vm0, %v343_v53 }
  0x88   : > { %1643 = vmatmul.mubr.msk.f32.gmra.mrb[18].mxu0 %vm285_vm0, %v1074_v54  ;;  %763 = vmatprep.mubr.f32.mxu1 %v2015_v7 }
  0x89   : > { %1261 = vmatprep.mubr.f32.mxu0 %v2015_v7 }
  0x8b   : > { %1612 = vmatmul.mubr.msk.f32.gmra.mrb[20].mxu1 %vm285_vm0, %v344_v55 }
  0x8c   : > { %1644 = vmatmul.mubr.msk.f32.gmra.mrb[20].mxu0 %vm285_vm0, %v1075_v56  ;;  %769 = vmatprep.mubr.f32.mxu1 %v2015_v7 }
  0x8d   : > { %1267 = vmatprep.mubr.f32.mxu0 %v2015_v7 }
  0x8f   : > { %1613 = vmatmul.mubr.msk.f32.gmra.mrb[22].mxu1 %vm285_vm0, %v345_v57 }
  0x90   : > { %1645 = vmatmul.mubr.msk.f32.gmra.mrb[22].mxu0 %vm285_vm0, %v1076_v58  ;;  %775 = vmatprep.mubr.f32.mxu1 %v2015_v7 }
  0x91   : > { %1273 = vmatprep.mubr.f32.mxu0 %v2015_v7 }
  0x93   : > { %1614 = vmatmul.mubr.msk.f32.gmra.mrb[24].mxu1 %vm285_vm0, %v346_v59 }
  0x94   : > { %1646 = vmatmul.mubr.msk.f32.gmra.mrb[24].mxu0 %vm285_vm0, %v1077_v60  ;;  %781 = vmatprep.mubr.f32.mxu1 %v2015_v7 }
  0x95   : > { %1279 = vmatprep.mubr.f32.mxu0 %v2015_v7 }
  0x97   : > { %1615 = vmatmul.mubr.msk.f32.gmra.mrb[26].mxu1 %vm285_vm0, %v347_v61 }
  0x98   : > { %1647 = vmatmul.mubr.msk.f32.gmra.mrb[26].mxu0 %vm285_vm0, %v1078_v62  ;;  %787 = vmatprep.mubr.f32.mxu1 %v2015_v7 }
  0x99   : > { %1285 = vmatprep.mubr.f32.mxu0 %v2015_v7 }
  0x9b   : > { %1616 = vmatmul.mubr.msk.f32.gmra.mrb[28].mxu1 %vm285_vm0, %v348_v63 }
  0x9c   : > { %1648 = vmatmul.mubr.msk.f32.gmra.mrb[28].mxu0 %vm285_vm0, %v1079_v0  ;;  %793 = vmatprep.mubr.f32.mxu1 %v2015_v7 }
  0x9d   : > { %1291 = vmatprep.mubr.f32.mxu0 %v2015_v7 }
  0x9f   : > { %1617 = vmatmul.mubr.msk.f32.gmra.mrb[30].mxu1 %vm285_vm0, %v349_v1 }
  0xa0   : > { %1649 = vmatmul.mubr.msk.f32.gmra.mrb[30].mxu0 %vm285_vm0, %v1080_v2  ;;  %1710 = vmatprep.mubr.f32.mxu1 %v1378_v3 }
 0x136   : > { %v705_v4 = vpop.f32.mrb[0].mxu1 }
 0x137   : > { %v1203_v5 = vpop.f32.mrb[0].mxu0  ;;  %v707_v8 = vpop.f32.mrb[1].mxu1 }
 0x138   : > { %v1777_v6 = vadd.f32 %v1203_v5, %v705_v4  ;;  %v1205_v9 = vpop.f32.mrb[1].mxu0 }
 0x139   : > { %v1778_v10 = vadd.f32 %v1205_v9, %v707_v8 }
 0x13a   : > { %v1330_v11 = vmul.f32 %v1777_v6, %v1777_v6  ;;  %v711_v7 = vpop.f32.mrb[2].mxu1 }
 0x13b   : > { %v1346_v12 = vmul.f32 %v1778_v10, %v1778_v10  ;;  %v1209_v13 = vpop.f32.mrb[2].mxu0  ;;  %v713_v15 = vpop.f32.mrb[3].mxu1 }
 0x13c   : > { %v1779_v14 = vadd.f32 %v1209_v13, %v711_v7  ;;  %v1211_v16 = vpop.f32.mrb[3].mxu0 }
 0x13d   : > { %v1362_v17 = vadd.f32 %v1346_v12, %v1330_v11  ;;  %v1780_v18 = vadd.f32 %v1211_v16, %v713_v15 }
 0x13e   : > { %v1331_v19 = vmul.f32 %v1779_v14, %v1779_v14  ;;  %v717_v21 = vpop.f32.mrb[4].mxu1 }
 0x13f   : > { %v1347_v20 = vmul.f32 %v1780_v18, %v1780_v18  ;;  %v1215_v22 = vpop.f32.mrb[4].mxu0  ;;  %v719_v24 = vpop.f32.mrb[5].mxu1 }
 0x140   : > { %v1781_v23 = vadd.f32 %v1215_v22, %v717_v21  ;;  %v1217_v25 = vpop.f32.mrb[5].mxu0 }
 0x141   : > { %v1363_v26 = vadd.f32 %v1347_v20, %v1331_v19  ;;  %v1782_v27 = vadd.f32 %v1217_v25, %v719_v24 }
 0x142   : > { %v1332_v28 = vmul.f32 %v1781_v23, %v1781_v23  ;;  %v723_v30 = vpop.f32.mrb[6].mxu1 }
 0x143   : > { %v1348_v29 = vmul.f32 %v1782_v27, %v1782_v27  ;;  %v1221_v31 = vpop.f32.mrb[6].mxu0  ;;  %v1745_v32 = vpack.c.bf16 %v1363_v26, %v1362_v17  ;;  %v725_v34 = vpop.f32.mrb[7].mxu1 }
 0x144   : > { %v1783_v33 = vadd.f32 %v1221_v31, %v723_v30  ;;  %v1223_v35 = vpop.f32.mrb[7].mxu0 }
 0x145   : > { %v1364_v36 = vadd.f32 %v1348_v29, %v1332_v28  ;;  %v1784_v37 = vadd.f32 %v1223_v35, %v725_v34  ;;  %1746 = vmatprep.subr.bf16.mxu1 %v1745_v32 }
 0x146   : > { %v1333_v38 = vmul.f32 %v1783_v33, %v1783_v33  ;;  %1748 = vmatpush3.bf16.xpose.msra.mxu1 %v1745_v32  ;;  %v729_v40 = vpop.f32.mrb[8].mxu1 }
 0x147   : > { %v1349_v39 = vmul.f32 %v1784_v37, %v1784_v37  ;;  %v1227_v41 = vpop.f32.mrb[8].mxu0  ;;  %v731_v43 = vpop.f32.mrb[9].mxu1 }
 0x148   : > { %v1785_v42 = vadd.f32 %v1227_v41, %v729_v40  ;;  %v1229_v44 = vpop.f32.mrb[9].mxu0 }
 0x149   : > { %v1365_v45 = vadd.f32 %v1349_v39, %v1333_v38  ;;  %v1786_v46 = vadd.f32 %v1229_v44, %v731_v43 }
 0x14a   : > { %v1334_v47 = vmul.f32 %v1785_v42, %v1785_v42  ;;  %v735_v49 = vpop.f32.mrb[10].mxu1 }
 0x14b   : > { %v1350_v48 = vmul.f32 %v1786_v46, %v1786_v46  ;;  %v1233_v50 = vpop.f32.mrb[10].mxu0  ;;  %v1749_v51 = vpack.c.bf16 %v1365_v45, %v1364_v36  ;;  %v737_v53 = vpop.f32.mrb[11].mxu1 }
 0x14c   : > { %v1787_v52 = vadd.f32 %v1233_v50, %v735_v49  ;;  %v1235_v54 = vpop.f32.mrb[11].mxu0 }
 0x14d   : > { %v1366_v55 = vadd.f32 %v1350_v48, %v1334_v47  ;;  %v1788_v56 = vadd.f32 %v1235_v54, %v737_v53  ;;  %1750 = vmatprep.subr.bf16.mxu1 %v1749_v51 }
 0x14e   : > { %v1335_v57 = vmul.f32 %v1787_v52, %v1787_v52  ;;  %1752 = vmatpush3.bf16.xpose.msra.mxu1 %v1749_v51  ;;  %v741_v59 = vpop.f32.mrb[12].mxu1 }
 0x14f   : > { %v1351_v58 = vmul.f32 %v1788_v56, %v1788_v56  ;;  %v1239_v60 = vpop.f32.mrb[12].mxu0  ;;  %v743_v62 = vpop.f32.mrb[13].mxu1 }
 0x150   : > { %v1789_v61 = vadd.f32 %v1239_v60, %v741_v59  ;;  %v1241_v63 = vpop.f32.mrb[13].mxu0 }
 0x151   : > { %v1367_v0 = vadd.f32 %v1351_v58, %v1335_v57  ;;  %v1790_v1 = vadd.f32 %v1241_v63, %v743_v62 }
 0x152   : > { %v1336_v2 = vmul.f32 %v1789_v61, %v1789_v61  ;;  %v747_v4 = vpop.f32.mrb[14].mxu1 }
 0x153   : > { %v1352_v3 = vmul.f32 %v1790_v1, %v1790_v1  ;;  %v1245_v5 = vpop.f32.mrb[14].mxu0  ;;  %v1753_v6 = vpack.c.bf16 %v1367_v0, %v1366_v55  ;;  %v749_v9 = vpop.f32.mrb[15].mxu1 }
 0x154   : > { %v1791_v8 = vadd.f32 %v1245_v5, %v747_v4  ;;  %v1247_v10 = vpop.f32.mrb[15].mxu0 }
 0x155   : > { %v1368_v11 = vadd.f32 %v1352_v3, %v1336_v2  ;;  %v1792_v12 = vadd.f32 %v1247_v10, %v749_v9  ;;  %1754 = vmatprep.subr.bf16.mxu1 %v1753_v6 }
 0x156   : > { %v1337_v7 = vmul.f32 %v1791_v8, %v1791_v8  ;;  %1756 = vmatpush3.bf16.xpose.msra.mxu1 %v1753_v6  ;;  %v753_v14 = vpop.f32.mrb[16].mxu1 }
 0x157   : > { %v1353_v13 = vmul.f32 %v1792_v12, %v1792_v12  ;;  %v1251_v15 = vpop.f32.mrb[16].mxu0  ;;  %v755_v17 = vpop.f32.mrb[17].mxu1 }
 0x158   : > { %v1793_v16 = vadd.f32 %v1251_v15, %v753_v14  ;;  %v1253_v18 = vpop.f32.mrb[17].mxu0 }
 0x159   : > { %v1369_v19 = vadd.f32 %v1353_v13, %v1337_v7  ;;  %v1794_v20 = vadd.f32 %v1253_v18, %v755_v17 }
 0x15a   : > { %v1338_v21 = vmul.f32 %v1793_v16, %v1793_v16  ;;  %v759_v23 = vpop.f32.mrb[18].mxu1 }
 0x15b   : > { %v1354_v22 = vmul.f32 %v1794_v20, %v1794_v20  ;;  %v1257_v24 = vpop.f32.mrb[18].mxu0  ;;  %v1757_v25 = vpack.c.bf16 %v1369_v19, %v1368_v11  ;;  %v761_v27 = vpop.f32.mrb[19].mxu1 }
 0x15c   : > { %v1795_v26 = vadd.f32 %v1257_v24, %v759_v23  ;;  %v1259_v28 = vpop.f32.mrb[19].mxu0 }
 0x15d   : > { %v1370_v29 = vadd.f32 %v1354_v22, %v1338_v21  ;;  %v1796_v30 = vadd.f32 %v1259_v28, %v761_v27  ;;  %1758 = vmatprep.subr.bf16.mxu1 %v1757_v25  ;;  %v1379_v28 = vld [vmem:[%s2437_s3 + $0x8] sm:$0xff] }
 0x15e   : > { %v1339_v31 = vmul.f32 %v1795_v26, %v1795_v26  ;;  %1760 = vmatpush3.bf16.xpose.msra.mxu1 %v1757_v25  ;;  %v765_v33 = vpop.f32.mrb[20].mxu1 }
 0x15f   : > { %v1355_v32 = vmul.f32 %v1796_v30, %v1796_v30  ;;  %v1263_v34 = vpop.f32.mrb[20].mxu0  ;;  %v767_v36 = vpop.f32.mrb[21].mxu1 }
 0x160   : > { %v1797_v35 = vadd.f32 %v1263_v34, %v765_v33  ;;  %v1265_v37 = vpop.f32.mrb[21].mxu0 }
 0x161   : > { %v1371_v38 = vadd.f32 %v1355_v32, %v1339_v31  ;;  %v1798_v39 = vadd.f32 %v1265_v37, %v767_v36 }
 0x162   : > { %v1340_v40 = vmul.f32 %v1797_v35, %v1797_v35  ;;  %v771_v42 = vpop.f32.mrb[22].mxu1 }
 0x163   : > { %v1356_v41 = vmul.f32 %v1798_v39, %v1798_v39  ;;  %v1269_v43 = vpop.f32.mrb[22].mxu0  ;;  %v1761_v44 = vpack.c.bf16 %v1371_v38, %v1370_v29  ;;  %v773_v46 = vpop.f32.mrb[23].mxu1 }
 0x164   : > { %v1799_v45 = vadd.f32 %v1269_v43, %v771_v42  ;;  %v1271_v47 = vpop.f32.mrb[23].mxu0 }
 0x165   : > { %v1372_v48 = vadd.f32 %v1356_v41, %v1340_v40  ;;  %v1800_v49 = vadd.f32 %v1271_v47, %v773_v46  ;;  %1762 = vmatprep.subr.bf16.mxu1 %v1761_v44 }
 0x166   : > { %v1341_v50 = vmul.f32 %v1799_v45, %v1799_v45  ;;  %1764 = vmatpush3.bf16.xpose.msra.mxu1 %v1761_v44  ;;  %v777_v52 = vpop.f32.mrb[24].mxu1 }
 0x167   : > { %v1357_v51 = vmul.f32 %v1800_v49, %v1800_v49  ;;  %v1275_v53 = vpop.f32.mrb[24].mxu0  ;;  %v779_v55 = vpop.f32.mrb[25].mxu1 }
 0x168   : > { %v1801_v54 = vadd.f32 %v1275_v53, %v777_v52  ;;  %v1277_v56 = vpop.f32.mrb[25].mxu0 }
 0x169   : > { %v1373_v57 = vadd.f32 %v1357_v51, %v1341_v50  ;;  %v1802_v58 = vadd.f32 %v1277_v56, %v779_v55 }
 0x16a   : > { %v1342_v59 = vmul.f32 %v1801_v54, %v1801_v54  ;;  %v783_v61 = vpop.f32.mrb[26].mxu1 }
 0x16b   : > { %v1358_v60 = vmul.f32 %v1802_v58, %v1802_v58  ;;  %v1281_v62 = vpop.f32.mrb[26].mxu0  ;;  %v1765_v63 = vpack.c.bf16 %v1373_v57, %v1372_v48  ;;  %v785_v1 = vpop.f32.mrb[27].mxu1 }
 0x16c   : > { %v1803_v0 = vadd.f32 %v1281_v62, %v783_v61  ;;  %v1283_v2 = vpop.f32.mrb[27].mxu0 }
 0x16d   : > { %v1374_v3 = vadd.f32 %v1358_v60, %v1342_v59  ;;  %v1804_v4 = vadd.f32 %v1283_v2, %v785_v1  ;;  %1766 = vmatprep.subr.bf16.mxu1 %v1765_v63 }
 0x16e   : > { %v1343_v5 = vmul.f32 %v1803_v0, %v1803_v0  ;;  %1768 = vmatpush3.bf16.xpose.msra.mxu1 %v1765_v63  ;;  %v789_v8 = vpop.f32.mrb[28].mxu1 }
 0x16f   : > { %v1359_v6 = vmul.f32 %v1804_v4, %v1804_v4  ;;  %v1287_v9 = vpop.f32.mrb[28].mxu0  ;;  %v791_v11 = vpop.f32.mrb[29].mxu1 }
 0x170   : > { %v1805_v10 = vadd.f32 %v1287_v9, %v789_v8  ;;  %v1289_v12 = vpop.f32.mrb[29].mxu0 }
 0x171   : > { %v1375_v7 = vadd.f32 %v1359_v6, %v1343_v5  ;;  %v1806_v13 = vadd.f32 %v1289_v12, %v791_v11 }
 0x172   : > { %v1344_v14 = vmul.f32 %v1805_v10, %v1805_v10  ;;  %v795_v16 = vpop.f32.mrb[30].mxu1 }
 0x173   : > { %v1360_v15 = vmul.f32 %v1806_v13, %v1806_v13  ;;  %v1293_v17 = vpop.f32.mrb[30].mxu0  ;;  %v1769_v18 = vpack.c.bf16 %v1375_v7, %v1374_v3  ;;  %v797_v20 = vpop.f32.mrb[31].mxu1 }
 0x174   : > { %v1807_v19 = vadd.f32 %v1293_v17, %v795_v16  ;;  %v1295_v21 = vpop.f32.mrb[31].mxu0 }
 0x175   : > { %v1376_v22 = vadd.f32 %v1360_v15, %v1344_v14  ;;  %v1808_v23 = vadd.f32 %v1295_v21, %v797_v20  ;;  %1770 = vmatprep.subr.bf16.mxu1 %v1769_v18 }
 0x176   : > { %v1345_v24 = vmul.f32 %v1807_v19, %v1807_v19  ;;  %1772 = vmatpush3.bf16.xpose.msra.mxu1 %v1769_v18 }
 0x177   : > { %v1361_v25 = vmul.f32 %v1808_v23, %v1808_v23 }
 0x179   : > { %v1377_v26 = vadd.f32 %v1361_v25, %v1345_v24 }
 0x17b   : > { %v1773_v27 = vpack.c.bf16 %v1377_v26, %v1376_v22 }
 0x17d   : > { %1774 = vmatprep.subr.bf16.mxu1 %v1773_v27 }
 0x17e   : > { %1776 = vmatpush3.bf16.xpose.msra.mxu1 %v1773_v27 }
 0x185   : > { %1711 = vmatmul.mubr.f32.vlgmr.msra.gmra.mrb[32].mxu1 %v1379_v28 }
 0x258   : > { %v1712_v29 = vpop.f32.mrb[32].mxu1 }
 0x259   : > { %v1452_v30 = vadd.f32 1e-05, %v1712_v29  ;;  %v1446_v31 = vpop.f32.mrb[33].mxu1 }
 0x25a   : > { %v1447_v32 = vadd.f32 1e-05, %v1446_v31 }
 0x25b   : > { %1931 = vlog2.f32 %v1452_v30 }
 0x25c   : > { %1933 = vlog2.f32 %v1447_v32 }
 0x265   : > { %v1932_v33 = vpop.eup %1931 }
 0x266   : > { %v1934_v34 = vpop.eup %1933  ;;  %v1458_v35 = vmul.f32 0.6931472, %v1932_v33 }
 0x267   : > { %v1456_v36 = vmul.f32 0.6931472, %v1934_v34 }
 0x268   : > { %v1460_v37 = vadd.f32 4.5, %v1458_v35 }
 0x269   : > { %v1459_v38 = vadd.f32 4.5, %v1456_v36 }
 0x26a   : > { %v1462_v39 = vmul.f32 0.2, %v1460_v37 }
 0x26b   : > { %v1461_v40 = vmul.f32 0.2, %v1459_v38 }
 0x26c   : > { %1464 = vst [vmem:[%s246_s9 + $0x8] sm:$0xff] %v1462_v39 }
 0x26d   : > { %1463 = vst [vmem:[%s246_s9] sm:$0xff] %v1461_v40 }
 0x26e   : > { %1948 = shalt.err (!%p1945_p5)
}
 0x26f   : > { %s1949_s26 = scalar_lea.hbm %s2386_s14, 256  ;;  %s1953_s30 = scalar_lea.hbm %s2438_s4, 512 }
 0x270   : > { %p1950_p6 = scmp.ne.s32.totalorder %s2386_s14, %s1949_s26  ;;  %p1954_p10 = scmp.lt.u32.totalorder %s2386_s14, %s2438_s4 }
 0x271   : > { %p1955_p11 = scmp.lt.u32.totalorder %s1953_s30, %s1949_s26  ;;  %p1957_p13 = scmp.lt.u32.totalorder %s1949_s26, %s2386_s14 }
 0x272   : > { %p1951_p7 = pnand %p1950_p6, %p2084_p4 }
 0x273   : > { %p1956_p12 = por %p1955_p11, %p1954_p10 }
 0x274   : > { %p1952_p9 = pneg %p1951_p7 }
 0x275   : > { %p1958_p0 = por %p1957_p13, %p1956_p12 }
 0x277   : > { %p1959_p1 = pnand %p1958_p0, %p1952_p9 }
 0x279   : > { %1962 = shalt.err (!%p1959_p1)
}
 0x27a   : > { %s2017_s9 = smov 128   ;;  %s2018_s11 = smov 8  }
 0x27b   : > { %1873 = dma.vmem_to_hbm [thread:$0]  (%p2084_p4), %s2381_s10, 256, %s2386_s14, %s2388_s21, %s2017_s9, %s2017_s9, %s2018_s11  }
 0x27c PF: > { %p1879_p2 = scmp.ge.s32.totalorder %s2013_s20, 2  ;;  %s1495_s12 = sand.u32 1, %s1993_s15  }
 0x27d   : > { %s1496_s13 = scalar_lea.sflag [#allocation4], %s1495_s12 }
 0x27e   : > { %p1876_p3 = pnand %p1879_p2, %p2091_p8 }
 0x280   : > { %1988 = dma.done.wait (!%p1876_p3), %s1496_s13, 256  }
 0x281   : > { %1990 = vsyncadd (!%p1876_p3), %s1496_s13, 4294967040  ;;  %s17_s20 = sadd.s32 1, %s2013_s20   ;;  %s2441_s15 = smov %s1997_s16 }
 0x282   : > { %p14_p5 = scmp.ge.s32.totalorder %s17_s20, 4   ;;  %s2442_s16 = smov %s2001_s17 }
 0x283   : > { %s2443_s17 = smov %s2097_s28  ;;  %s2444_s18 = smov %s2009_s19 }
 0x284   : > { %s2445_s19 = smov %s2447_s23  ;;  %16 = sbr.rel (!%p14_p5) target bundleno = 4 (0x4), region = 74 }
 0x28b   :  { %1501 = vsyncpa [#allocation4], 1 }
 0x28c   :  { %1503 = vsyncpa [#allocation4 + $0x1], 1 }

</bundles_post_ra>
